<compile_context>
chip_gen: v7x
topology: tpu7x:2x2x1
jax: 0.10.0
libtpu: 0.0.40
codegen_flags: <defaults>
</compile_context>

<pallas_src>
import functools

import jax
import jax.numpy as jnp
from jax import lax
from jax.experimental import pallas as pl
from jax.experimental.pallas import tpu as pltpu


# ---------------------------------------------------------------- kernels ---

def _to_q_kernel(z_ref, wq_ref, bq_ref, q_ref, *, scale):
    # z_ref: (B*M, D)  wq_ref: (D, H*C)  bq_ref: (1, H*C)  q_ref: (B*M, H*C)
    q = jnp.dot(z_ref[...], wq_ref[...], preferred_element_type=jnp.float32)
    q_ref[...] = ((q + bq_ref[...]) * scale).astype(q_ref.dtype)


def _m2f_attn_out_kernel(q_ref, x_ref, z_ref, wo_ref, bo_ref, o_ref, *, heads):
    # q_ref: (1, H, M, C)   x_ref: (1, C, HW)   z_ref: (1, M, D)
    # wo_ref: (H*C, D)      bo_ref: (1, D)      o_ref: (1, M, D)
    x = x_ref[0]                                     # (C, HW), hw on lanes
    c = q_ref.shape[3]

    # residual + output bias accumulated in f32
    acc = z_ref[0].astype(jnp.float32) + bo_ref[...]  # (M, D)

    for h in range(heads):                           # static unroll, heads small
        qh = q_ref[0, h]                             # (M, C)
        # dots = (q * scale) @ x  -> (M, HW), lane-dense along HW
        dots = jnp.dot(qh, x, preferred_element_type=jnp.float32)
        dots = dots - jnp.max(dots, axis=-1, keepdims=True)
        e = jnp.exp(dots)
        attn = e * pl.reciprocal(jnp.sum(e, axis=-1, keepdims=True), approx=True)
        # out_h = attn @ x^T  (contract HW of attn against HW of x) -> (M, C)
        oh = lax.dot_general(attn, x, (((1,), (1,)), ((), ())),
                             preferred_element_type=jnp.float32)
        # fold rearrange + to_out: out_cat @ wo == sum_h oh @ wo[h*c:(h+1)*c]
        acc = acc + jnp.dot(oh, wo_ref[h * c:(h + 1) * c, :],
                            preferred_element_type=jnp.float32)

    o_ref[0] = acc.astype(o_ref.dtype)


# --------------------------------------------------------------- wrappers ---

def to_q_pallas(z2, wq, bq, scale):
    R, K = z2.shape
    N = wq.shape[1]
    kernel = functools.partial(_to_q_kernel, scale=scale)
    return pl.pallas_call(
        kernel,
        out_shape=jax.ShapeDtypeStruct((R, N), z2.dtype),
        grid=(1,),
        in_specs=[pl.BlockSpec((R, K), lambda i: (0, 0)),
                  pl.BlockSpec((K, N), lambda i: (0, 0)),
                  pl.BlockSpec((1, N), lambda i: (0, 0))],
        out_specs=pl.BlockSpec((R, N), lambda i: (0, 0)),
    )(z2, wq, bq)


def m2f_attention_out_pallas(q, x_chw, z, wo, bo):
    B, H, M, C = q.shape
    HW = x_chw.shape[2]
    D = z.shape[2]
    kernel = functools.partial(_m2f_attn_out_kernel, heads=H)
    return pl.pallas_call(
        kernel,
        out_shape=jax.ShapeDtypeStruct((B, M, D), z.dtype),
        grid=(B,),
        in_specs=[pl.BlockSpec((1, H, M, C), lambda i: (i, 0, 0, 0)),
                  pl.BlockSpec((1, C, HW), lambda i: (i, 0, 0)),
                  pl.BlockSpec((1, M, D), lambda i: (i, 0, 0)),
                  pl.BlockSpec((H * C, D), lambda i: (0, 0)),
                  pl.BlockSpec((1, D), lambda i: (0, 0))],
        out_specs=pl.BlockSpec((1, M, D), lambda i: (i, 0, 0)),
        compiler_params=pltpu.CompilerParams(dimension_semantics=("parallel",)),
    )(q, x_chw, z, wo, bo)


def mobile2former_forward(x, z, params, heads):
    """x: (b, c, h, w) NCHW,  z: (b, m, d).  Returns (b, m, d)."""
    b, c, h, w = x.shape
    _, m, d = z.shape
    wq, bq, wo, bo = params
    scale = float(c) ** -0.5

    # to_q over all b*m token rows in one matmul, scale folded in-kernel.
    q_flat = to_q_pallas(z.reshape(b * m, d), wq, bq, scale)   # (b*m, heads*c)

    # torch's .view(b, heads, m, c): pure row-major reinterpretation (free).
    q = q_flat.reshape(b, heads, m, c)

    # keep x channel-major (b, c, h*w): no transpose, hw rides the lane axis.
    x_chw = x.reshape(b, c, h * w)

    # fused: attention (all heads) + rearrange + to_out + residual.
    return m2f_attention_out_pallas(q, x_chw, z, wo, bo)


# -------------------------------------------------------------- reference ---

def _reference(x, z, wq, bq, wo, bo, heads):
    b, c, h, w = x.shape
    _, m, d = z.shape
    q = (z @ wq + bq).reshape(b, heads, m, c)
    xf = x.reshape(b, c, h * w).transpose(0, 2, 1)[:, None]   # (b, 1, hw, c)
    dots = q @ jnp.swapaxes(xf, 2, 3) * (float(c) ** -0.5)
    attn = jax.nn.softmax(dots, axis=-1)
    out = attn @ xf
    out = out.transpose(0, 2, 1, 3).reshape(b, m, heads * c)
    return z + out @ wo + bo


# -------------------------------------------------------------------- main ---

if __name__ == "__main__":
    b, c, h, w = 2, 8, 16, 16      # x: (b, channel, h, w)
    m, d, heads = 8, 32, 2         # z: (b, m, dim)
    inner = heads * c

    key = jax.random.PRNGKey(0)
    k1, k2, k3, k4, k5, k6 = jax.random.split(key, 6)
    x = jax.random.normal(k1, (b, c, h, w), jnp.float32)
    z = jax.random.normal(k2, (b, m, d), jnp.float32)
    # deterministic synthetic weights (Linear stored pre-transposed: (in, out))
    wq = jax.random.normal(k3, (d, inner), jnp.float32) * (1.0 / jnp.sqrt(d))
    bq = jax.random.normal(k4, (1, inner), jnp.float32) * 0.02
    wo = jax.random.normal(k5, (inner, d), jnp.float32) * (1.0 / jnp.sqrt(inner))
    bo = jax.random.normal(k6, (1, d), jnp.float32) * 0.02

    out = mobile2former_forward(x, z, (wq, bq, wo, bo), heads)
    out = jax.block_until_ready(out)

    ref = _reference(x, z, wq, bq, wo, bo, heads)
    assert out.shape == (b, m, d)
    assert jnp.allclose(out, ref, atol=5e-2, rtol=5e-2)

    print("KERNEL_OK")
</pallas_src>

<mosaic_0001>
module attributes {stable_mosaic.version = 11 : i64} {
  func.func @_to_q_kernel(%arg0: i32, %arg1: memref<16x32xf32, #tpu.memory_space<vmem>>, %arg2: memref<32x16xf32, #tpu.memory_space<vmem>>, %arg3: memref<1x16xf32, #tpu.memory_space<vmem>>, %arg4: memref<16x16xf32, #tpu.memory_space<vmem>>) attributes {dimension_semantics = [#tpu.dimension_semantics<arbitrary>], iteration_bounds = array<i64: 1>, scalar_prefetch = 0 : i64, scratch_operands = 0 : i64, tpu.core_type = #tpu.core_type<tc>, window_params = [{pipeline_mode = #tpu.pipeline_mode<synchronous>, transform_indices = @transform_0, window_bounds = array<i64: 16, 32>}, {pipeline_mode = #tpu.pipeline_mode<synchronous>, transform_indices = @transform_1, window_bounds = array<i64: 32, 16>}, {pipeline_mode = #tpu.pipeline_mode<synchronous>, transform_indices = @transform_2, window_bounds = array<i64: 1, 16>}, {pipeline_mode = #tpu.pipeline_mode<synchronous>, transform_indices = @transform_3, window_bounds = array<i64: 16, 16>}]} {
    %c0 = arith.constant 0 : index
    %c0_0 = arith.constant 0 : index
    %0 = vector.load %arg1[%c0, %c0_0] : memref<16x32xf32, #tpu.memory_space<vmem>>, vector<16x32xf32>
    %c0_1 = arith.constant 0 : index
    %c0_2 = arith.constant 0 : index
    %1 = vector.load %arg2[%c0_1, %c0_2] : memref<32x16xf32, #tpu.memory_space<vmem>>, vector<32x16xf32>
    %cst = arith.constant dense<0.000000e+00> : vector<16x16xf32>
    %2 = tpu.matmul %0, %1, %cst {dimension_numbers = #tpu.dot_dimension_numbers<[1], [0], [0], [1], [0, 0, 1, 1], [], []>} : vector<16x32xf32>, vector<32x16xf32>, vector<16x16xf32> -> vector<16x16xf32>
    %c0_3 = arith.constant 0 : index
    %c0_4 = arith.constant 0 : index
    %3 = vector.load %arg3[%c0_3, %c0_4] : memref<1x16xf32, #tpu.memory_space<vmem>>, vector<1x16xf32>
    %4 = vector.broadcast %3 : vector<1x16xf32> to vector<16x16xf32>
    %5 = arith.addf %2, %4 : vector<16x16xf32>
    %cst_5 = arith.constant 0.353553385 : f32
    %6 = vector.broadcast %cst_5 : f32 to vector<16x16xf32>
    %7 = arith.mulf %5, %6 : vector<16x16xf32>
    %c0_6 = arith.constant 0 : index
    %c0_7 = arith.constant 0 : index
    %8 = vector.load %arg4[%c0_6, %c0_7] : memref<16x16xf32, #tpu.memory_space<vmem>>, vector<16x16xf32>
    tpu.vector_store %arg4[%c0_6, %c0_7], %7 {strides = array<i32>} : memref<16x16xf32, #tpu.memory_space<vmem>>, vector<16x16xf32>,
    return
  }
  func.func @transform_0(%arg0: i32) -> (i32, i32) {
    %c0_i32 = arith.constant 0 : i32
    %c0_i32_0 = arith.constant 0 : i32
    %c0_i32_1 = arith.constant 0 : i32
    return %c0_i32, %c0_i32_0 : i32, i32
  }
  func.func @transform_1(%arg0: i32) -> (i32, i32) {
    %c0_i32 = arith.constant 0 : i32
    %c0_i32_0 = arith.constant 0 : i32
    %c0_i32_1 = arith.constant 0 : i32
    return %c0_i32, %c0_i32_0 : i32, i32
  }
  func.func @transform_2(%arg0: i32) -> (i32, i32) {
    %c0_i32 = arith.constant 0 : i32
    %c0_i32_0 = arith.constant 0 : i32
    %c0_i32_1 = arith.constant 0 : i32
    return %c0_i32, %c0_i32_0 : i32, i32
  }
  func.func @transform_3(%arg0: i32) -> (i32, i32) {
    %c0_i32 = arith.constant 0 : i32
    %c0_i32_0 = arith.constant 0 : i32
    %c0_i32_1 = arith.constant 0 : i32
    return %c0_i32, %c0_i32_0 : i32, i32
  }
}

</mosaic_0001>

<bundles_post_ra>
// kernel: tpu_custom_call.1
= control target key start
LH: loop header
LB: loop body
LE: loop exit
PB: predicated region body
PF: predicated region fallthrough
CT: control target
= control target key end

     0   :  { %vm28_vm0 = vcmask 261120   ;;  %s242_s0 = inlined_call_operand.vmem [shape: f32[16,32], index: 0, kind: input, shape index: {}]   ;;  %s243_s1 = inlined_call_operand.vmem [shape: f32[32,16], index: 1, kind: input, shape index: {}]   ;;  %s244_s2 = inlined_call_operand.vmem [shape: f32[1,16], index: 2, kind: input, shape index: {}]   ;;  %s245_s3 = inlined_call_operand.hbm [shape: f32[16,16], index: 3, kind: output, shape index: {}]  }
   0x1   :  { %v17_v0 = vld [vmem:[%s243_s1] sm:$0xff]  ;;  %v18_v1 = vld [vmem:[%s243_s1 + $0x8] sm:$0xff]  ;;  %v19_v2 = vld [vmem:[%s243_s1 + $0x10] sm:$0xff] }
   0x2   :  { %v151_v3 = vpack.c.bf16 %v18_v1, %v17_v0  ;;  %v20_v4 = vld [vmem:[%s243_s1 + $0x18] sm:$0xff]  ;;  %v15_v5 = vld [vmem:[%s242_s0] sm:$0xff] }
   0x3   :  { %v155_v6 = vpack.c.bf16 %v20_v4, %v19_v2  ;;  %148 = vmatprep.mubr.msk.f32.mxu0 %vm28_vm0, %v15_v5 }
   0x4   :  { %8 = vsyncpa [#allocation3], 0  ;;  %152 = vmatprep.subr.bf16.mxu0 %v151_v3  ;;  %v16_v7 = vld [vmem:[%s242_s0 + $0x8] sm:$0xff]  ;;  %v131_v8 = vld [vmem:[%s244_s2] ss:$0 sm:$0xff]  ;;  %s186_s1 = smov [#allocation2]  }
   0x5   :  { %154 = vmatpush3.bf16.msra.mxu0 %v151_v3  ;;  %s120_s26 = sshll.u32 %s186_s1, 4  ;;  %vm112_vm1 = vcmask 130048   ;;  %s121_s26 = int_to_ptr.vmem [resolvable:$true] %s120_s26 }
   0x6   :  { %156 = vmatprep.subr.bf16.mxu0 %v155_v6  ;;  %s162_s27 = scalar_lea.vmem %s121_s26, 256  ;;  %p167_p1 = scmp.lt.s32.totalorder %s121_s26, %s121_s26 }
   0x7   :  { %p163_p0 = scmp.ne.s32.totalorder %s121_s26, %s162_s27  ;;  %p168_p2 = scmp.lt.s32.totalorder %s162_s27, %s162_s27 }
   0x9   :  { %158 = vmatpush3.bf16.msra.mxu0 %v155_v6  ;;  %p169_p3 = por %p168_p2, %p167_p1 }
   0xb   :  { %p170_p4 = pnand %p169_p3, %p163_p0 }
   0xc   :  { %149 = vmatmul.mubr.msk.f32.vlgmr.msra.gmra.mrb[0].mxu0 %vm28_vm0, %v16_v7 }
  0xdf   :  { %v150_v9 = vpop.f32.mrb[0].mxu0 }
  0xe0   :  { %v107_v10 = vadd.f32 %v150_v9, %v131_v8  ;;  %v101_v11 = vpop.f32.mrb[1].mxu0 }
  0xe1   :  { %v102_v12 = vadd.f32 %v131_v8, %v101_v11 }
  0xe2   :  { %v111_v13 = vmul.f32 0.35355338, %v107_v10 }
  0xe3   :  { %v110_v14 = vmul.f32 0.35355338, %v102_v12 }
  0xe4   :  { %114 = vst.msk [vmem:[#allocation2 + $0x8] sm:$0xff] %vm112_vm1, %v111_v13 }
  0xe5   :  { %113 = vst.msk [vmem:[#allocation2] sm:$0xff] %vm112_vm1, %v110_v14 }
  0xe6   :  { %173 = shalt.err (!%p170_p4)
}
  0xe7   :  { %s174_s28 = scalar_lea.hbm %s245_s3, 256 }
  0xe8   :  { %p175_p5 = scmp.ne.s32.totalorder %s245_s3, %s174_s28  ;;  %p178_p6 = scmp.lt.u32.totalorder %s174_s28, %s245_s3 }
  0xea   :  { %p180_p7 = pnand %p178_p6, %p175_p5 }
  0xec   :  { %183 = shalt.err (!%p180_p7)
}
  0xed   :  { %s187_s6 = smov 128   ;;  %s188_s7 = smov 8  }
  0xee   :  { %126 = dma.vmem_to_hbm [thread:$0]  %s121_s26, 256, %s245_s3, [#allocation3], %s187_s6, %s187_s6, %s188_s7  }
  0xef   :  { %184 = dma.done.wait [#allocation3], 256  }
  0xf0   :  { %185 = vsyncadd [#allocation3], 4294967040 }
  0xf1   :  { %130 = vsyncpa [#allocation3], 1 }

</bundles_post_ra>
